<compile_context>
chip_gen: v7x
topology: tpu7x:2x2x1
jax: 0.10.0
libtpu: 0.0.40
codegen_flags: <defaults>
</compile_context>

<pallas_src>
import jax
import jax.numpy as jnp
import numpy as np
from jax.experimental import pallas as pl
from jax.experimental.pallas import tpu as pltpu


def _ta_v2_kernel(x_ref, wa_ref, p_ref, wb_ref, o_ref):
    # x_ref : (B, S, C)       masked calibrate_emb (mask folded in wrapper)
    # wa_ref: (K*C, MID)      conv_a weight, im2col (tap-major) layout
    # p_ref : (3, MID)        packed [conv_a bias, LN gamma, LN beta]
    # wb_ref: (K*MID, COUT)   conv_b weight, im2col layout (no bias)
    # o_ref : (B, S, COUT)    output, already in final (B, S, c_out) order
    B, S, C = x_ref.shape
    MID = wa_ref.shape[1]
    COUT = wb_ref.shape[1]

    x = x_ref[...]                                          # (B, S, C)

    # --- conv_a as a single im2col matmul: taps (s-1, s, s+1) on lanes ---
    zc = jnp.zeros((B, 1, C), jnp.float32)
    xi = jnp.concatenate(
        [jnp.concatenate([zc, x[:, :S - 1, :]], axis=1),    # tap 0: x[s-1]
         x,                                                 # tap 1: x[s]
         jnp.concatenate([x[:, 1:, :], zc], axis=1)],       # tap 2: x[s+1]
        axis=-1).reshape(B * S, 3 * C)
    h = jnp.dot(xi, wa_ref[...], preferred_element_type=jnp.float32)
    h = h + p_ref[0:1, :]                                   # conv_a bias

    # --- LayerNorm over mid_dim (lane axis) ---
    mu = jnp.mean(h, axis=-1, keepdims=True)
    var = jnp.mean((h - mu) ** 2, axis=-1, keepdims=True)
    hn = (h - mu) * jax.lax.rsqrt(var + 1e-5)
    hn = hn * p_ref[1:2, :] + p_ref[2:3, :]

    # --- QuickGELU: x * sigmoid(1.702 x) ---
    a = (hn * jax.nn.sigmoid(1.702 * hn)).reshape(B, S, MID)

    # --- conv_b (bias=False) as a single im2col matmul ---
    zm = jnp.zeros((B, 1, MID), jnp.float32)
    ai = jnp.concatenate(
        [jnp.concatenate([zm, a[:, :S - 1, :]], axis=1),
         a,
         jnp.concatenate([a[:, 1:, :], zm], axis=1)],
        axis=-1).reshape(B * S, 3 * MID)
    y = jnp.dot(ai, wb_ref[...],
                preferred_element_type=jnp.float32).reshape(B, S, COUT)

    # --- softmax over the sequence dim (PyTorch dim=-1 of (B, c_out, S)),
    #     scaled by S; output already (B, S, c_out) == final permute(0,2,1) ---
    mx = jnp.max(y, axis=1, keepdims=True)
    e = jnp.exp(y - mx)
    inv = pl.reciprocal(jnp.sum(e, axis=1, keepdims=True), approx=False)
    o_ref[...] = (e * inv * jnp.float32(S)).astype(o_ref.dtype)


def ta_module_v2_pallas(calibrate_emb, v_mask, wa_t, ba, ln_g, ln_b, wb_t):
    """calibrate_emb: (B, S, C) f32, v_mask: (B, S) f32.
    PyTorch-shaped params: wa_t (MID, C, K), ba (MID,), ln_g/ln_b (MID,),
    wb_t (COUT, MID, K).  Returns (B, S, COUT)."""
    B, S, C = calibrate_emb.shape
    MID, _, K = wa_t.shape
    COUT = wb_t.shape[0]
    assert K == 3, "padding=1 Conv1d in the module implies kernel_size=3"

    # Mask multiply folded into the wrapper (einsum('bsc,bs->bsc')); XLA fuses
    # it with the upstream concat for free, so the kernel gets masked input.
    x = (calibrate_emb * v_mask[:, :, None]).astype(jnp.float32)

    # Re-layout conv weights to im2col (tap-major, channels-last): (K*Cin, Cout).
    wa = jnp.transpose(wa_t, (2, 1, 0)).reshape(K * C, MID)
    wb = jnp.transpose(wb_t, (2, 1, 0)).reshape(K * MID, COUT)

    # Pack conv_a bias + LayerNorm gamma/beta into a single operand (one DMA).
    packed = jnp.stack([ba, ln_g, ln_b], axis=0).astype(jnp.float32)

    vmem = pl.BlockSpec(memory_space=pltpu.MemorySpace.VMEM)
    return pl.pallas_call(
        _ta_v2_kernel,
        out_shape=jax.ShapeDtypeStruct((B, S, COUT), jnp.float32),
        in_specs=[vmem, vmem, vmem, vmem],
        out_specs=vmem,
    )(x, wa, packed, wb)


def reference_jax(cc_emb, cls_emb, v_mask, params):
    """Pure-JAX reference reproducing the PyTorch forward (concat=True)."""
    wg, bg, wa_t, ba, ln_g, ln_b, wb_t = params
    B, S, _ = cls_emb.shape
    g_out = cc_emb @ wg.T + bg                                   # (B, cc)
    cal = jnp.concatenate(
        [cls_emb, jnp.broadcast_to(g_out[:, None, :], (B, S, g_out.shape[-1]))],
        axis=-1)
    cal = cal * v_mask[:, :, None]                               # bsc,bs->bsc
    x = jnp.transpose(cal, (0, 2, 1))                            # (B, C, S)
    # conv_a: torch weight (MID, C, K), padding=1
    xp = jnp.pad(x, ((0, 0), (0, 0), (1, 1)))
    h = jnp.stack([
        jnp.einsum('bcs,oc->bos', xp[:, :, k:k + S], wa_t[:, :, k])
        for k in range(wa_t.shape[2])], axis=0).sum(0) + ba[None, :, None]
    # LayerNorm over mid_dim
    hT = jnp.transpose(h, (0, 2, 1))
    mu = hT.mean(-1, keepdims=True)
    var = ((hT - mu) ** 2).mean(-1, keepdims=True)
    hT = (hT - mu) / jnp.sqrt(var + 1e-5) * ln_g + ln_b
    h = jnp.transpose(hT, (0, 2, 1))
    h = h * jax.nn.sigmoid(1.702 * h)                            # QuickGELU
    hp = jnp.pad(h, ((0, 0), (0, 0), (1, 1)))
    y = jnp.stack([
        jnp.einsum('bcs,oc->bos', hp[:, :, k:k + S], wb_t[:, :, k])
        for k in range(wb_t.shape[2])], axis=0).sum(0)           # (B, COUT, S)
    y = jax.nn.softmax(y, axis=-1) * S
    return jnp.transpose(y, (0, 2, 1))                           # (B, S, COUT)


if __name__ == "__main__":
    # Small shapes consistent with the module.
    B, S = 2, 8
    c_in, cc_dim, mid_dim, c_out, kernels = 24, 8, 32, 16, 3
    C = c_in + cc_dim

    key = jax.random.PRNGKey(0)
    keys = jax.random.split(key, 10)
    cc_emb = jax.random.normal(keys[0], (B, cc_dim), jnp.float32)
    cls_emb = jax.random.normal(keys[1], (B, S, c_in), jnp.float32)
    v_mask = (jax.random.uniform(keys[2], (B, S)) > 0.2).astype(jnp.float32)

    # Deterministic parameters (PyTorch shapes).
    wg = 0.1 * jax.random.normal(keys[3], (cc_dim, cc_dim), jnp.float32)
    bg = 0.1 * jax.random.normal(keys[4], (cc_dim,), jnp.float32)
    wa_t = 0.1 * jax.random.normal(keys[5], (mid_dim, C, kernels), jnp.float32)
    ba = 0.1 * jax.random.normal(keys[6], (mid_dim,), jnp.float32)
    ln_g = jnp.ones((mid_dim,), jnp.float32)
    ln_b = jnp.zeros((mid_dim,), jnp.float32)
    wb_t = 0.1 * jax.random.normal(keys[7], (c_out, mid_dim, kernels), jnp.float32)
    params = (wg, bg, wa_t, ba, ln_g, ln_b, wb_t)

    # Glue in plain JAX: g(cc_emb), broadcast + concat with cls_emb.
    g_out = cc_emb @ wg.T + bg
    calibrate_emb = jnp.concatenate(
        [cls_emb, jnp.broadcast_to(g_out[:, None, :], (B, S, cc_dim))], axis=-1)

    out = ta_module_v2_pallas(calibrate_emb, v_mask, wa_t, ba, ln_g, ln_b, wb_t)
    out = jax.block_until_ready(out)

    ref = reference_jax(cc_emb, cls_emb, v_mask, params)
    np.testing.assert_allclose(np.asarray(out), np.asarray(ref),
                               rtol=1e-4, atol=1e-4)
    print("KERNEL_OK")
</pallas_src>

<mosaic_0001>
module attributes {stable_mosaic.version = 11 : i64} {
  func.func @_ta_v2_kernel(%arg0: memref<2x8x32xf32, #tpu.memory_space<vmem>>, %arg1: memref<96x32xf32, #tpu.memory_space<vmem>>, %arg2: memref<3x32xf32, #tpu.memory_space<vmem>>, %arg3: memref<96x16xf32, #tpu.memory_space<vmem>>, %arg4: memref<2x8x16xf32, #tpu.memory_space<vmem>>) attributes {dimension_semantics = [], scalar_prefetch = 0 : i64, scratch_operands = 0 : i64, tpu.core_type = #tpu.core_type<tc>} {
    %c0 = arith.constant 0 : index
    %c0_0 = arith.constant 0 : index
    %c0_1 = arith.constant 0 : index
    %0 = vector.load %arg0[%c0, %c0_0, %c0_1] : memref<2x8x32xf32, #tpu.memory_space<vmem>>, vector<2x8x32xf32>
    %cst = arith.constant 0.000000e+00 : f32
    %1 = vector.broadcast %cst : f32 to vector<2x1x32xf32>
    %2 = vector.extract_strided_slice %0 {offsets = [0, 0, 0], sizes = [2, 7, 32], strides = [1, 1, 1]} : vector<2x8x32xf32> to vector<2x7x32xf32>
    %3 = tpu.concatenate %1, %2 in 1 : vector<2x1x32xf32>, vector<2x7x32xf32> -> vector<2x8x32xf32>
    %4 = vector.extract_strided_slice %0 {offsets = [0, 1, 0], sizes = [2, 7, 32], strides = [1, 1, 1]} : vector<2x8x32xf32> to vector<2x7x32xf32>
    %5 = tpu.concatenate %4, %1 in 1 : vector<2x7x32xf32>, vector<2x1x32xf32> -> vector<2x8x32xf32>
    %6 = tpu.concatenate %3, %0, %5 in 2 : vector<2x8x32xf32>, vector<2x8x32xf32>, vector<2x8x32xf32> -> vector<2x8x96xf32>
    %7 = vector.shape_cast %6 : vector<2x8x96xf32> to vector<16x96xf32>
    %c0_2 = arith.constant 0 : index
    %c0_3 = arith.constant 0 : index
    %8 = vector.load %arg1[%c0_2, %c0_3] : memref<96x32xf32, #tpu.memory_space<vmem>>, vector<96x32xf32>
    %cst_4 = arith.constant dense<0.000000e+00> : vector<16x32xf32>
    %9 = tpu.matmul %7, %8, %cst_4 {dimension_numbers = #tpu.dot_dimension_numbers<[1], [0], [0], [1], [0, 0, 1, 1], [], []>} : vector<16x96xf32>, vector<96x32xf32>, vector<16x32xf32> -> vector<16x32xf32>
    %c0_5 = arith.constant 0 : index
    %c0_6 = arith.constant 0 : index
    %10 = vector.load %arg2[%c0_5, %c0_6] : memref<3x32xf32, #tpu.memory_space<vmem>>, vector<1x32xf32>
    %11 = vector.broadcast %10 : vector<1x32xf32> to vector<16x32xf32>
    %12 = arith.addf %9, %11 : vector<16x32xf32>
    %cst_7 = arith.constant dense<0.000000e+00> : vector<16xf32>
    %13 = vector.multi_reduction <add>, %12, %cst_7 [1] : vector<16x32xf32> to vector<16xf32>
    %14 = vector.shape_cast %13 : vector<16xf32> to vector<16x1xf32>
    %cst_8 = arith.constant 3.200000e+01 : f32
    %15 = vector.broadcast %cst_8 : f32 to vector<16x1xf32>
    %16 = arith.divf %14, %15 : vector<16x1xf32>
    %17 = vector.broadcast %16 : vector<16x1xf32> to vector<16x32xf32>
    %18 = arith.subf %12, %17 : vector<16x32xf32>
    %19 = arith.mulf %18, %18 : vector<16x32xf32>
    %cst_9 = arith.constant dense<0.000000e+00> : vector<16xf32>
    %20 = vector.multi_reduction <add>, %19, %cst_9 [1] : vector<16x32xf32> to vector<16xf32>
    %21 = vector.shape_cast %20 : vector<16xf32> to vector<16x1xf32>
    %cst_10 = arith.constant 3.200000e+01 : f32
    %22 = vector.broadcast %cst_10 : f32 to vector<16x1xf32>
    %23 = arith.divf %21, %22 : vector<16x1xf32>
    %24 = vector.broadcast %16 : vector<16x1xf32> to vector<16x32xf32>
    %25 = arith.subf %12, %24 : vector<16x32xf32>
    %cst_11 = arith.constant 9.99999974E-6 : f32
    %26 = vector.broadcast %cst_11 : f32 to vector<16x1xf32>
    %27 = arith.addf %23, %26 : vector<16x1xf32>
    %28 = math.rsqrt %27 : vector<16x1xf32>
    %29 = vector.broadcast %28 : vector<16x1xf32> to vector<16x32xf32>
    %30 = arith.mulf %25, %29 : vector<16x32xf32>
    %c1 = arith.constant 1 : index
    %c0_12 = arith.constant 0 : index
    %31 = vector.load %arg2[%c1, %c0_12] : memref<3x32xf32, #tpu.memory_space<vmem>>, vector<1x32xf32>
    %32 = vector.broadcast %31 : vector<1x32xf32> to vector<16x32xf32>
    %33 = arith.mulf %30, %32 : vector<16x32xf32>
    %c2 = arith.constant 2 : index
    %c0_13 = arith.constant 0 : index
    %34 = vector.load %arg2[%c2, %c0_13] : memref<3x32xf32, #tpu.memory_space<vmem>>, vector<1x32xf32>
    %35 = vector.broadcast %34 : vector<1x32xf32> to vector<16x32xf32>
    %36 = arith.addf %33, %35 : vector<16x32xf32>
    %cst_14 = arith.constant 1.702000e+00 : f32
    %37 = vector.broadcast %cst_14 : f32 to vector<16x32xf32>
    %38 = arith.mulf %37, %36 : vector<16x32xf32>
    %39 = arith.negf %38 : vector<16x32xf32>
    %40 = math.exp %39 : vector<16x32xf32>
    %cst_15 = arith.constant 1.000000e+00 : f32
    %41 = vector.broadcast %cst_15 : f32 to vector<16x32xf32>
    %42 = arith.addf %41, %40 : vector<16x32xf32>
    %43 = arith.divf %41, %42 : vector<16x32xf32>
    %44 = arith.mulf %36, %43 : vector<16x32xf32>
    %45 = vector.shape_cast %44 : vector<16x32xf32> to vector<2x8x32xf32>
    %cst_16 = arith.constant 0.000000e+00 : f32
    %46 = vector.broadcast %cst_16 : f32 to vector<2x1x32xf32>
    %47 = vector.extract_strided_slice %45 {offsets = [0, 0, 0], sizes = [2, 7, 32], strides = [1, 1, 1]} : vector<2x8x32xf32> to vector<2x7x32xf32>
    %48 = tpu.concatenate %46, %47 in 1 : vector<2x1x32xf32>, vector<2x7x32xf32> -> vector<2x8x32xf32>
    %49 = vector.extract_strided_slice %45 {offsets = [0, 1, 0], sizes = [2, 7, 32], strides = [1, 1, 1]} : vector<2x8x32xf32> to vector<2x7x32xf32>
    %50 = tpu.concatenate %49, %46 in 1 : vector<2x7x32xf32>, vector<2x1x32xf32> -> vector<2x8x32xf32>
    %51 = tpu.concatenate %48, %45, %50 in 2 : vector<2x8x32xf32>, vector<2x8x32xf32>, vector<2x8x32xf32> -> vector<2x8x96xf32>
    %52 = vector.shape_cast %51 : vector<2x8x96xf32> to vector<16x96xf32>
    %c0_17 = arith.constant 0 : index
    %c0_18 = arith.constant 0 : index
    %53 = vector.load %arg3[%c0_17, %c0_18] : memref<96x16xf32, #tpu.memory_space<vmem>>, vector<96x16xf32>
    %cst_19 = arith.constant dense<0.000000e+00> : vector<16x16xf32>
    %54 = tpu.matmul %52, %53, %cst_19 {dimension_numbers = #tpu.dot_dimension_numbers<[1], [0], [0], [1], [0, 0, 1, 1], [], []>} : vector<16x96xf32>, vector<96x16xf32>, vector<16x16xf32> -> vector<16x16xf32>
    %55 = vector.shape_cast %54 : vector<16x16xf32> to vector<2x8x16xf32>
    %cst_20 = arith.constant dense<0xFF800000> : vector<2x16xf32>
    %56 = vector.multi_reduction <maximumf>, %55, %cst_20 [1] : vector<2x8x16xf32> to vector<2x16xf32>
    %57 = vector.shape_cast %56 : vector<2x16xf32> to vector<2x1x16xf32>
    %58 = vector.broadcast %57 : vector<2x1x16xf32> to vector<2x8x16xf32>
    %59 = arith.subf %55, %58 : vector<2x8x16xf32>
    %60 = math.exp %59 : vector<2x8x16xf32>
    %cst_21 = arith.constant dense<0.000000e+00> : vector<2x16xf32>
    %61 = vector.multi_reduction <add>, %60, %cst_21 [1] : vector<2x8x16xf32> to vector<2x16xf32>
    %62 = vector.shape_cast %61 : vector<2x16xf32> to vector<2x1x16xf32>
    %63 = tpu.reciprocal %62 : vector<2x1x16xf32> -> vector<2x1x16xf32>
    %64 = vector.broadcast %63 : vector<2x1x16xf32> to vector<2x8x16xf32>
    %65 = arith.mulf %60, %64 : vector<2x8x16xf32>
    %cst_22 = arith.constant 8.000000e+00 : f32
    %66 = vector.broadcast %cst_22 : f32 to vector<2x8x16xf32>
    %67 = arith.mulf %65, %66 : vector<2x8x16xf32>
    %c0_23 = arith.constant 0 : index
    %c0_24 = arith.constant 0 : index
    %c0_25 = arith.constant 0 : index
    %68 = vector.load %arg4[%c0_23, %c0_24, %c0_25] : memref<2x8x16xf32, #tpu.memory_space<vmem>>, vector<2x8x16xf32>
    tpu.vector_store %arg4[%c0_23, %c0_24, %c0_25], %67 {strides = array<i32>} : memref<2x8x16xf32, #tpu.memory_space<vmem>>, vector<2x8x16xf32>,
    return
  }
}

</mosaic_0001>

<bundles_post_ra>
// kernel: tpu_custom_call.1
= control target key start
LH: loop header
LB: loop body
LE: loop exit
PB: predicated region body
PF: predicated region fallthrough
CT: control target
= control target key end

     0   :  { %vm33_vm0 = vcmask 1046528   ;;  %s584_s21 = smov 32   ;;  %s585_s5 = smov 64   ;;  %s751_s0 = inlined_call_operand.vmem [shape: f32[2,8,32], index: 0, kind: input, shape index: {}]   ;;  %s752_s1 = inlined_call_operand.vmem [shape: f32[96,32], index: 1, kind: input, shape index: {}]   ;;  %s753_s2 = inlined_call_operand.vmem [shape: f32[3,32], index: 2, kind: input, shape index: {}]   ;;  %s754_s3 = inlined_call_operand.vmem [shape: f32[96,16], index: 3, kind: input, shape index: {}]   ;;  %s755_s4 = inlined_call_operand.hbm [shape: f32[2,8,16], index: 4, kind: output, shape index: {}]  }
   0x1   :  { %v18_v0 = vld [vmem:[%s751_s0] sm:$0xff]  ;;  %v19_v1 = vld [vmem:[%s751_s0 + $0x8] sm:$0xff]  ;;  %v58_v6 = vld [vmem:[%s752_s1 + $0x10] sm:$0xff] }
   0x2   :  { %v56_v2 = vld [vmem:[%s752_s1] sm:$0xff]  ;;  %36 = vrot.lane.b32.xlu0 %v18_v0, %s584_s21  ;;  %v29_v3 = vrot.slane %v18_v0, 1  ;;  %v30_v4 = vrot.slane %v19_v1, 1  ;;  %v57_v5 = vld [vmem:[%s752_s1 + $0x8] sm:$0xff]  ;;  %v59_v8 = vld [vmem:[%s752_s1 + $0x18] sm:$0xff] }
   0x3   :  { %v487_v7 = vpack.c.bf16 %v57_v5, %v56_v2  ;;  %v491_v10 = vpack.c.bf16 %v59_v8, %v58_v6  ;;  %v60_v11 = vld [vmem:[%s752_s1 + $0x20] sm:$0xff]  ;;  %v61_v12 = vld [vmem:[%s752_s1 + $0x28] sm:$0xff] }
   0x4   :  { %v34_v9 = vsel %vm33_vm0, %v29_v3, 0.0  ;;  %v35_v13 = vsel %vm33_vm0, %v30_v4, 0.0 }
   0x5   :  { %44 = vrot.lane.b32.xlu1 %v34_v9, %s585_s5  ;;  %488 = vmatprep.subr.bf16.mxu0 %v487_v7 }
   0x6   :  { %38 = vrot.lane.b32.xlu0 %v19_v1, %s584_s21  ;;  %490 = vmatpush3.bf16.msra.mxu0 %v487_v7 }
   0x7   :  { %9 = vsyncpa [#allocation3], 0  ;;  %492 = vmatprep.subr.bf16.mxu0 %v491_v10  ;;  %v495_v14 = vpack.c.bf16 %v61_v12, %v60_v11  ;;  %v62_v15 = vld [vmem:[%s752_s1 + $0x30] sm:$0xff]  ;;  %v63_v16 = vld [vmem:[%s752_s1 + $0x38] sm:$0xff]  ;;  %v22_v24 = vrot.slane %v18_v0, 7  ;;  %vm26_vm1 = vcmask 1040384  }
   0x8   :  { %v499_v17 = vpack.c.bf16 %v63_v16, %v62_v15  ;;  %v64_v18 = vld [vmem:[%s752_s1 + $0x40] sm:$0xff]  ;;  %v65_v19 = vld [vmem:[%s752_s1 + $0x48] sm:$0xff]  ;;  %v66_v21 = vld [vmem:[%s752_s1 + $0x50] sm:$0xff]  ;;  %v23_v25 = vrot.slane %v19_v1, 7  ;;  %vm50_vm2 = vcmask 261120   ;;  %vm53_vm3 = vcmask 523264  }
   0x9   :  { %46 = vrot.lane.b32.xlu1 %v35_v13, %s585_s5  ;;  %v503_v20 = vpack.c.bf16 %v65_v19, %v64_v18  ;;  %v67_v22 = vld [vmem:[%s752_s1 + $0x58] sm:$0xff]  ;;  %v27_v26 = vsel %vm26_vm1, 0.0, %v22_v24  ;;  %vm73_vm4 = vcmask 785408   ;;  %v396_v36 = vld [vmem:[%s753_s2] ss:$0 sm:$0xff]  ;;  %v245_v54 = vld [vmem:[%s754_s3 + $0x8] sm:$0xff] }
   0xa   :  { %494 = vmatpush3.bf16.msra.mxu0 %v491_v10  ;;  %v507_v23 = vpack.c.bf16 %v67_v22, %v66_v21  ;;  %v28_v29 = vsel %vm26_vm1, 0.0, %v23_v25  ;;  %v244_v53 = vld [vmem:[%s754_s3] sm:$0xff]  ;;  %v246_v55 = vld [vmem:[%s754_s3 + $0x10] sm:$0xff]  ;;  %v247_v57 = vld [vmem:[%s754_s3 + $0x18] sm:$0xff]  ;;  %vm337_vm5 = vcmask 130048  }
   0xb   :  { %496 = vmatprep.subr.bf16.mxu0 %v495_v14  ;;  %v511_v56 = vpack.c.bf16 %v245_v54, %v244_v53  ;;  %v515_v58 = vpack.c.bf16 %v247_v57, %v246_v55  ;;  %v248_v59 = vld [vmem:[%s754_s3 + $0x20] sm:$0xff]  ;;  %v249_v60 = vld [vmem:[%s754_s3 + $0x28] sm:$0xff]  ;;  %v250_v62 = vld [vmem:[%s754_s3 + $0x30] sm:$0xff] }
   0xc   :  { %v519_v61 = vpack.c.bf16 %v249_v60, %v248_v59  ;;  %v251_v63 = vld [vmem:[%s754_s3 + $0x38] sm:$0xff]  ;;  %v399_v8 = vld [vmem:[%s753_s2 + $0x1] ss:$0 sm:$0xff]  ;;  %v400_v10 = vld [vmem:[%s753_s2 + $0x2] ss:$0 sm:$0xff] }
   0xd   :  { %512 = vmatprep.subr.bf16.mxu1 %v511_v56  ;;  %v523_v0 = vpack.c.bf16 %v251_v63, %v250_v62  ;;  %v253_v24 = vld [vmem:[%s754_s3 + $0x48] sm:$0xff] }
   0xe   :  { %498 = vmatpush3.bf16.msra.mxu0 %v495_v14  ;;  %514 = vmatpush3.bf16.msra.mxu1 %v511_v56 }
   0xf   :  { %500 = vmatprep.subr.bf16.mxu0 %v499_v17  ;;  %516 = vmatprep.subr.bf16.mxu1 %v515_v58 }
  0x12   :  { %502 = vmatpush3.bf16.msra.mxu0 %v499_v17  ;;  %518 = vmatpush3.bf16.msra.mxu1 %v515_v58 }
  0x13   :  { %504 = vmatprep.subr.bf16.mxu0 %v503_v20  ;;  %520 = vmatprep.subr.bf16.mxu1 %v519_v61 }
  0x16   :  { %506 = vmatpush3.bf16.msra.mxu0 %v503_v20  ;;  %522 = vmatpush3.bf16.msra.mxu1 %v519_v61 }
  0x17   :  { %508 = vmatprep.subr.bf16.mxu0 %v507_v23  ;;  %524 = vmatprep.subr.bf16.mxu1 %v523_v0 }
  0x1a   :  { %510 = vmatpush3.bf16.msra.mxu0 %v507_v23  ;;  %526 = vmatpush3.bf16.msra.mxu1 %v523_v0  ;;  %v252_v23 = vld [vmem:[%s754_s3 + $0x40] sm:$0xff] }
  0x1b   :  { %v527_v25 = vpack.c.bf16 %v253_v24, %v252_v23 }
  0x1d   :  { %528 = vmatprep.subr.bf16.mxu1 %v527_v25 }
  0x1e   :  { %530 = vmatpush3.bf16.msra.mxu1 %v527_v25 }
  0x74   :  { %v37_v27 = vpop.permute.xlu0 %36 }
  0x75   :  { %v51_v28 = vsel %vm50_vm2, %v27_v26, %v37_v27 }
  0x77   :  { %v45_v30 = vpop.permute.xlu1 %44 }
  0x78   :  { %v54_v31 = vsel %vm53_vm3, %v51_v28, %v45_v30  ;;  %v39_v32 = vpop.permute.xlu0 %38  ;;  %v254_v28 = vld [vmem:[%s754_s3 + $0x50] sm:$0xff] }
  0x79   :  { %457 = vmatprep.mubr.msk.f32.mxu0 %vm73_vm4, %v54_v31  ;;  %v52_v33 = vsel %vm50_vm2, %v28_v29, %v39_v32  ;;  %v255_v29 = vld [vmem:[%s754_s3 + $0x58] sm:$0xff]  ;;  %s586_s3 = smov [#allocation2]  }
  0x7a   :  { %v531_v30 = vpack.c.bf16 %v255_v29, %v254_v28 }
  0x7b   :  { %v47_v34 = vpop.permute.xlu1 %46 }
  0x7c   :  { %v55_v35 = vsel %vm53_vm3, %v52_v33, %v47_v34  ;;  %532 = vmatprep.subr.bf16.mxu1 %v531_v30 }
  0x7d   :  { %458 = vmatmul.mubr.msk.f32.vlgmr.msra.gmra.mrb[0].mxu0 %vm73_vm4, %v55_v35  ;;  %534 = vmatpush3.bf16.msra.mxu1 %v531_v30 }
 0x150   :  { %v459_v37 = vpop.f32.mrb[0].mxu0 }
 0x151   :  { %v152_v38 = vadd.f32 %v459_v37, %v396_v36  ;;  %v146_v39 = vpop.f32.mrb[1].mxu0 }
 0x152   :  { %v147_v40 = vadd.f32 %v396_v36, %v146_v39 }
 0x153   :  { %v158_v41 = vsel %vm50_vm2, %v152_v38, 0.0 }
 0x154   :  { %159 = vadd.xlane.f32.xlu1 %v158_v41  ;;  %v155_v42 = vsel %vm50_vm2, %v147_v40, 0.0 }
 0x155   :  { %156 = vadd.xlane.f32.xlu0 %v155_v42 }
 0x1e1   :  { %v160_v43 = vpop.xlane.xlu1 %159 }
 0x1e2   :  { %v163_v44 = vmul.f32 0.03125, %v160_v43  ;;  %v157_v45 = vpop.xlane.xlu0 %156 }
 0x1e3   :  { %v162_v46 = vmul.f32 0.03125, %v157_v45 }
 0x1e4   :  { %v165_v47 = vsub.f32 %v152_v38, %v163_v44 }
 0x1e5   :  { %v164_v48 = vsub.f32 %v147_v40, %v162_v46 }
 0x1e6   :  { %v167_v51 = vmul.f32 %v165_v47, %v165_v47 }
 0x1e7   :  { %v166_v49 = vmul.f32 %v164_v48, %v164_v48 }
 0x1e8   :  { %v171_v52 = vsel %vm50_vm2, %v167_v51, 0.0 }
 0x1e9   :  { %v168_v50 = vsel %vm50_vm2, %v166_v49, 0.0 }
 0x1ea   :  { %169 = vadd.xlane.f32.xlu0 %v168_v50 }
 0x1ee   :  { %172 = vadd.xlane.f32.xlu0 %v171_v52 }
 0x277   :  { %v170_v1 = vpop.xlane.xlu0 %169 }
 0x278   :  { %v174_v2 = vmul.f32 0.03125, %v170_v1 }
 0x27a   :  { %v176_v3 = vadd.f32 1e-05, %v174_v2 }
 0x27b   :  { %v173_v4 = vpop.xlane.xlu0 %172 }
 0x27c   :  { %540 = vrsqrt.f32 %v176_v3  ;;  %v175_v5 = vmul.f32 0.03125, %v173_v4 }
 0x27e   :  { %v177_v6 = vadd.f32 1e-05, %v175_v5 }
 0x280   :  { %542 = vrsqrt.f32 %v177_v6 }
 0x286   :  { %v541_v7 = vpop.eup %540 }
 0x287   :  { %v180_v9 = vmul.f32 %v541_v7, %v164_v48 }
 0x289   :  { %v187_v11 = vmul.f32 %v399_v8, %v180_v9 }
 0x28a   :  { %v543_v12 = vpop.eup %542 }
 0x28b   :  { %v194_v13 = vadd.f32 %v400_v10, %v187_v11  ;;  %v181_v14 = vmul.f32 %v543_v12, %v165_v47 }
 0x28d   :  { %v401_v15 = vmul.f32 -1.702, %v194_v13  ;;  %v188_v16 = vmul.f32 %v399_v8, %v181_v14 }
 0x28f   :  { %v200_v17 = vmul.f32 1.442695, %v401_v15  ;;  %v195_v18 = vadd.f32 %v400_v10, %v188_v16 }
 0x291   :  { %544 = vpow2.f32 %v200_v17  ;;  %v402_v19 = vmul.f32 -1.702, %v195_v18 }
 0x293   :  { %v202_v20 = vmul.f32 1.442695, %v402_v19 }
 0x295   :  { %546 = vpow2.f32 %v202_v20 }
 0x29b   :  { %v545_v21 = vpop.eup %544 }
 0x29c   :  { %v204_v22 = vadd.f32 1.0, %v545_v21 }
 0x29e   :  { %548 = vrcp.f32 %v204_v22 }
 0x29f   :  { %v547_v26 = vpop.eup %546 }
 0x2a0   :  { %v205_v27 = vadd.f32 1.0, %v547_v26 }
 0x2a2   :  { %550 = vrcp.f32 %v205_v27 }
 0x2a8   :  { %v549_v31 = vpop.eup %548 }
 0x2a9   :  { %v210_v32 = vmul.f32 %v549_v31, %v194_v13 }
 0x2ab   :  { %226 = vrot.lane.b32.xlu1 %v210_v32, %s584_s21  ;;  %v220_v33 = vrot.slane %v210_v32, 1  ;;  %v214_v39 = vrot.slane %v210_v32, 7 }
 0x2ac   :  { %v551_v34 = vpop.eup %550 }
 0x2ad   :  { %v224_v35 = vsel %vm33_vm0, %v220_v33, 0.0  ;;  %v211_v36 = vmul.f32 %v551_v34, %v195_v18  ;;  %v218_v41 = vsel %vm26_vm1, 0.0, %v214_v39 }
 0x2af   :  { %234 = vrot.lane.b32.xlu1 %v224_v35, %s585_s5  ;;  %228 = vrot.lane.b32.xlu0 %v211_v36, %s584_s21  ;;  %v221_v37 = vrot.slane %v211_v36, 1  ;;  %v215_v42 = vrot.slane %v211_v36, 7  ;;  %s385_s21 = sshll.u32 %s586_s3, 4  ;;  %s386_s21 = int_to_ptr.vmem [resolvable:$true] %s385_s21 }
 0x2b0   :  { %p565_p1 = scmp.lt.s32.totalorder %s386_s21, %s386_s21 }
 0x2b1   :  { %v225_v38 = vsel %vm33_vm0, %v221_v37, 0.0  ;;  %v219_v47 = vsel %vm26_vm1, 0.0, %v215_v42 }
 0x2b3   :  { %236 = vrot.lane.b32.xlu1 %v225_v38, %s585_s5  ;;  %s560_s5 = scalar_lea.vmem %s386_s21, 256 }
 0x2b4   :  { %p561_p0 = scmp.ne.s32.totalorder %s386_s21, %s560_s5  ;;  %p566_p2 = scmp.lt.s32.totalorder %s560_s5, %s560_s5 }
 0x2b6   :  { %p567_p3 = por %p566_p2, %p565_p1 }
 0x2b8   :  { %p568_p4 = pnand %p567_p3, %p561_p0 }
 0x31d   :  { %v227_v40 = vpop.permute.xlu1 %226 }
 0x31e   :  { %v240_v43 = vsel %vm50_vm2, %v218_v41, %v227_v40 }
 0x321   :  { %v235_v44 = vpop.permute.xlu1 %234  ;;  %v229_v45 = vpop.permute.xlu0 %228 }
 0x322   :  { %v242_v46 = vsel %vm53_vm3, %v240_v43, %v235_v44  ;;  %v241_v48 = vsel %vm50_vm2, %v219_v47, %v229_v45 }
 0x323   :  { %484 = vmatprep.mubr.msk.f32.mxu1 %vm73_vm4, %v242_v46 }
 0x325   :  { %v237_v49 = vpop.permute.xlu1 %236 }
 0x326   :  { %v243_v50 = vsel %vm53_vm3, %v241_v48, %v237_v49 }
 0x327   :  { %485 = vmatmul.mubr.msk.f32.vlgmr.msra.gmra.mrb[0].mxu1 %vm73_vm4, %v243_v50 }
 0x3fa   :  { %v486_v51 = vpop.f32.mrb[0].mxu1 }
 0x3fb   :  { %v345_v52 = vsel %vm337_vm5, %v486_v51, -inf  ;;  %v328_v53 = vpop.f32.mrb[1].mxu1 }
 0x3fc   :  { %v346_v54 = vrot.slane %v345_v52, 4  ;;  %v338_v55 = vsel %vm337_vm5, %v328_v53, -inf }
 0x3fd   :  { %v339_v56 = vrot.slane %v338_v55, 4 }
 0x3fe   :  { %v347_v57 = vmax.f32 %v345_v52, %v346_v54 }
 0x3ff   :  { %v340_v58 = vmax.f32 %v338_v55, %v339_v56 }
 0x400   :  { %v348_v59 = vrot.slane %v347_v57, 2 }
 0x401   :  { %v341_v60 = vrot.slane %v340_v58, 2 }
 0x402   :  { %v349_v61 = vmax.f32 %v347_v57, %v348_v59 }
 0x403   :  { %v342_v62 = vmax.f32 %v340_v58, %v341_v60 }
 0x404   :  { %v350_v63 = vrot.slane %v349_v61, 1 }
 0x405   :  { %v343_v0 = vrot.slane %v342_v62, 1 }
 0x406   :  { %v351_v1 = vmax.f32 %v349_v61, %v350_v63 }
 0x407   :  { %v344_v2 = vmax.f32 %v342_v62, %v343_v0 }
 0x408   :  { %v353_v3 = vsub.f32 %v486_v51, %v351_v1 }
 0x409   :  { %v352_v4 = vsub.f32 %v328_v53, %v344_v2 }
 0x40a   :  { %v356_v5 = vmul.f32 1.442695, %v353_v3 }
 0x40b   :  { %v354_v6 = vmul.f32 1.442695, %v352_v4 }
 0x40c   :  { %552 = vpow2.f32 %v356_v5 }
 0x40d   :  { %554 = vpow2.f32 %v354_v6 }
 0x416   :  { %v553_v7 = vpop.eup %552 }
 0x417   :  { %v555_v8 = vpop.eup %554  ;;  %v365_v9 = vsel %vm337_vm5, %v553_v7, 0.0 }
 0x418   :  { %v366_v10 = vrot.slane %v365_v9, 4  ;;  %v358_v11 = vsel %vm337_vm5, %v555_v8, 0.0 }
 0x419   :  { %v359_v12 = vrot.slane %v358_v11, 4 }
 0x41a   :  { %v367_v13 = vadd.f32 %v366_v10, %v365_v9 }
 0x41b   :  { %v360_v14 = vadd.f32 %v359_v12, %v358_v11 }
 0x41c   :  { %v368_v15 = vrot.slane %v367_v13, 2 }
 0x41d   :  { %v361_v16 = vrot.slane %v360_v14, 2 }
 0x41e   :  { %v369_v17 = vadd.f32 %v368_v15, %v367_v13 }
 0x41f   :  { %v362_v18 = vadd.f32 %v361_v16, %v360_v14 }
 0x420   :  { %v370_v19 = vrot.slane %v369_v17, 1 }
 0x421   :  { %v363_v20 = vrot.slane %v362_v18, 1 }
 0x422   :  { %v371_v21 = vadd.f32 %v370_v19, %v369_v17 }
 0x423   :  { %v364_v22 = vadd.f32 %v363_v20, %v362_v18 }
 0x424   :  { %556 = vrcp.f32 %v371_v21 }
 0x425   :  { %558 = vrcp.f32 %v364_v22 }
 0x42e   :  { %v557_v23 = vpop.eup %556 }
 0x42f   :  { %v559_v24 = vpop.eup %558  ;;  %v375_v25 = vmul.f32 %v557_v23, %v553_v7 }
 0x430   :  { %v374_v26 = vmul.f32 %v559_v24, %v555_v8 }
 0x431   :  { %v377_v27 = vmul.f32 8.0, %v375_v25 }
 0x432   :  { %v376_v28 = vmul.f32 8.0, %v374_v26 }
 0x433   :  { %379 = vst.msk [vmem:[#allocation2 + $0x8] sm:$0xff] %vm337_vm5, %v377_v27 }
 0x434   :  { %378 = vst.msk [vmem:[#allocation2] sm:$0xff] %vm337_vm5, %v376_v28 }
 0x435   :  { %571 = shalt.err (!%p568_p4)
}
 0x436   :  { %s572_s23 = scalar_lea.hbm %s755_s4, 256 }
 0x437   :  { %p573_p5 = scmp.ne.s32.totalorder %s755_s4, %s572_s23  ;;  %p576_p6 = scmp.lt.u32.totalorder %s572_s23, %s755_s4 }
 0x439   :  { %p578_p7 = pnand %p576_p6, %p573_p5 }
 0x43b   :  { %581 = shalt.err (!%p578_p7)
}
 0x43c   :  { %s587_s27 = smov 128   ;;  %s588_s28 = smov 8  }
 0x43d   :  { %391 = dma.vmem_to_hbm [thread:$0]  %s386_s21, 256, %s755_s4, [#allocation3], %s587_s27, %s587_s27, %s588_s28  }
 0x43e   :  { %582 = dma.done.wait [#allocation3], 256  }
 0x43f   :  { %583 = vsyncadd [#allocation3], 4294967040 }
 0x440   :  { %395 = vsyncpa [#allocation3], 1 }

</bundles_post_ra>
